<compile_context>
chip_gen: v7x
topology: tpu7x:2x2x1
jax: 0.10.0
libtpu: 0.0.40
codegen_flags: <defaults>
</compile_context>

<pallas_src>
import jax
import jax.numpy as jnp
from jax.experimental import pallas as pl
from jax.experimental.pallas import tpu as pltpu


def lstm_kernel(x_ref, wih_ref, whh_ref, out_ref):
    # x_ref:   (T*B, E_pad)  time-major flat input with ones column (bias fold)
    # wih_ref: (E_pad, 4H)   W_ih^T with the bias row appended
    # whh_ref: (H, 4H)       W_hh^T
    # out_ref: (B, H)        final hidden state h_T
    B, H = out_ref.shape
    TB = x_ref.shape[0]
    T = TB // B
    H2 = 2 * H
    H3 = 3 * H

    # ---- Hoisted input projection (bias included): one MXU call for all t. --
    xp = jnp.dot(x_ref[...], wih_ref[...],
                 preferred_element_type=jnp.float32)        # (T*B, 4H), t-major

    # ---- Serial recurrence over time (fully unrolled; T is static). --------
    w_hh = whh_ref[...]                                      # hoisted VMEM load
    h = jnp.zeros((B, H), jnp.float32)
    c = jnp.zeros((B, H), jnp.float32)
    for t in range(T):
        # Contiguous static sublane slice of the precomputed projection.
        gates = xp[t * B:(t + 1) * B, :] + jnp.dot(
            h, w_hh, preferred_element_type=jnp.float32)     # (B, 4H)

        # EUP work only on the lanes that are actually used.
        i_f = jax.nn.sigmoid(gates[:, :H2])                  # i | f
        g_g = jnp.tanh(gates[:, H2:H3])                      # g
        o_g = jax.nn.sigmoid(gates[:, H3:])                  # o
        i_g = i_f[:, :H]
        f_g = i_f[:, H:]

        c = f_g * c + i_g * g_g
        h = o_g * jnp.tanh(c)

    # (B, H) = (2, 32): masked vst + tiny writeback DMA — negligible here.
    out_ref[...] = h.astype(out_ref.dtype)


def _augment_inputs(x_tb_flat, w_ih_t, bias):
    """Fold bias into the input projection and align the contraction dim.

    Appends a ones column to the flat time-major x and the bias row to W_ih^T,
    then zero-pads the shared contraction dim to a multiple of 8 sublanes.
    """
    TB, E = x_tb_flat.shape
    H4 = w_ih_t.shape[1]
    k = E + 1
    k_pad = ((k + 7) // 8) * 8
    x_aug = (jnp.zeros((TB, k_pad), x_tb_flat.dtype)
             .at[:, :E].set(x_tb_flat)
             .at[:, E].set(1.0))
    w_aug = (jnp.zeros((k_pad, H4), w_ih_t.dtype)
             .at[:E, :].set(w_ih_t)
             .at[E, :].set(bias))
    return x_aug, w_aug


def lstm_projection(x, w_ih_t, w_hh_t, bias):
    """x: (B, T, E) float32 (PyTorch layout). Returns final hidden state (B, H)."""
    B, T, E = x.shape
    H4 = w_ih_t.shape[1]
    H = H4 // 4

    # Time-major flat layout so the kernel's per-step slice is contiguous rows.
    x_tb_flat = jnp.transpose(x, (1, 0, 2)).reshape(T * B, E)
    x_aug, w_aug = _augment_inputs(x_tb_flat, w_ih_t, bias)

    return pl.pallas_call(
        lstm_kernel,
        out_shape=jax.ShapeDtypeStruct((B, H), jnp.float32),
        in_specs=[
            pl.BlockSpec(memory_space=pltpu.MemorySpace.VMEM),  # x_aug  (T*B, E_pad)
            pl.BlockSpec(memory_space=pltpu.MemorySpace.VMEM),  # W_ih^T+bias (E_pad, 4H)
            pl.BlockSpec(memory_space=pltpu.MemorySpace.VMEM),  # W_hh^T (H, 4H)
        ],
        out_specs=pl.BlockSpec(memory_space=pltpu.MemorySpace.VMEM),
    )(x_aug, w_aug, w_hh_t)


def lstm_reference(x, w_ih_t, w_hh_t, bias):
    """Pure-JAX reference (lax.scan) mirroring torch.nn.LSTM semantics."""
    B, T, E = x.shape
    H = w_hh_t.shape[0]
    x_tbe = jnp.transpose(x, (1, 0, 2))

    def step(carry, x_t):
        h, c = carry
        gates = x_t @ w_ih_t + h @ w_hh_t + bias
        i = jax.nn.sigmoid(gates[:, 0 * H:1 * H])
        f = jax.nn.sigmoid(gates[:, 1 * H:2 * H])
        g = jnp.tanh(gates[:, 2 * H:3 * H])
        o = jax.nn.sigmoid(gates[:, 3 * H:4 * H])
        c = f * c + i * g
        h = o * jnp.tanh(c)
        return (h, c), None

    h0 = jnp.zeros((B, H), jnp.float32)
    c0 = jnp.zeros((B, H), jnp.float32)
    (h_final, _), _ = jax.lax.scan(step, (h0, c0), x_tbe)
    return h_final


if __name__ == "__main__":
    # Small shapes implied by the module: batch=2, seq=8, embedding_dim=8, hidden=32.
    B, T, E, H = 2, 8, 8, 32

    key = jax.random.PRNGKey(0)
    k_x, k_wih, k_whh, k_bih, k_bhh = jax.random.split(key, 5)

    x = jax.random.normal(k_x, (B, T, E), dtype=jnp.float32)

    # Deterministic synthetic parameters (shapes follow nn.LSTM(embedding_dim, hidden_size)).
    scale = 1.0 / jnp.sqrt(jnp.float32(H))
    w_ih = jax.random.uniform(k_wih, (4 * H, E), jnp.float32, -scale, scale)   # weight_ih_l0
    w_hh = jax.random.uniform(k_whh, (4 * H, H), jnp.float32, -scale, scale)   # weight_hh_l0
    b_ih = jax.random.uniform(k_bih, (4 * H,), jnp.float32, -scale, scale)     # bias_ih_l0
    b_hh = jax.random.uniform(k_bhh, (4 * H,), jnp.float32, -scale, scale)     # bias_hh_l0

    w_ih_t = w_ih.T                 # (E, 4H)
    w_hh_t = w_hh.T                 # (H, 4H)
    bias = b_ih + b_hh              # (4H,)

    out = lstm_projection(x, w_ih_t, w_hh_t, bias)
    out = jax.block_until_ready(out)

    ref = lstm_reference(x, w_ih_t, w_hh_t, bias)
    assert out.shape == (B, H)
    assert jnp.allclose(out, ref, atol=1e-5, rtol=1e-5), "Pallas LSTM mismatch vs reference"

    print("KERNEL_OK")
</pallas_src>

<mosaic_0001>
module attributes {stable_mosaic.version = 11 : i64} {
  func.func @lstm_kernel(%arg0: memref<16x16xf32, #tpu.memory_space<vmem>>, %arg1: memref<16x128xf32, #tpu.memory_space<vmem>>, %arg2: memref<32x128xf32, #tpu.memory_space<vmem>>, %arg3: memref<2x32xf32, #tpu.memory_space<vmem>>) attributes {dimension_semantics = [], scalar_prefetch = 0 : i64, scratch_operands = 0 : i64, tpu.core_type = #tpu.core_type<tc>} {
    %c0 = arith.constant 0 : index
    %c0_0 = arith.constant 0 : index
    %0 = vector.load %arg0[%c0, %c0_0] : memref<16x16xf32, #tpu.memory_space<vmem>>, vector<16x16xf32>
    %c0_1 = arith.constant 0 : index
    %c0_2 = arith.constant 0 : index
    %1 = vector.load %arg1[%c0_1, %c0_2] : memref<16x128xf32, #tpu.memory_space<vmem>>, vector<16x128xf32>
    %cst = arith.constant dense<0.000000e+00> : vector<16x128xf32>
    %2 = tpu.matmul %0, %1, %cst {dimension_numbers = #tpu.dot_dimension_numbers<[1], [0], [0], [1], [0, 0, 1, 1], [], []>} : vector<16x16xf32>, vector<16x128xf32>, vector<16x128xf32> -> vector<16x128xf32>
    %c0_3 = arith.constant 0 : index
    %c0_4 = arith.constant 0 : index
    %3 = vector.load %arg2[%c0_3, %c0_4] : memref<32x128xf32, #tpu.memory_space<vmem>>, vector<32x128xf32>
    %cst_5 = arith.constant 0.000000e+00 : f32
    %4 = vector.broadcast %cst_5 : f32 to vector<2x32xf32>
    %cst_6 = arith.constant 0.000000e+00 : f32
    %5 = vector.broadcast %cst_6 : f32 to vector<2x32xf32>
    %6 = vector.extract_strided_slice %2 {offsets = [0, 0], sizes = [2, 128], strides = [1, 1]} : vector<16x128xf32> to vector<2x128xf32>
    %cst_7 = arith.constant dense<0.000000e+00> : vector<2x128xf32>
    %7 = tpu.matmul %4, %3, %cst_7 {dimension_numbers = #tpu.dot_dimension_numbers<[1], [0], [0], [1], [0, 0, 1, 1], [], []>} : vector<2x32xf32>, vector<32x128xf32>, vector<2x128xf32> -> vector<2x128xf32>
    %8 = arith.addf %6, %7 : vector<2x128xf32>
    %9 = vector.extract_strided_slice %8 {offsets = [0, 0], sizes = [2, 64], strides = [1, 1]} : vector<2x128xf32> to vector<2x64xf32>
    %10 = arith.negf %9 : vector<2x64xf32>
    %11 = math.exp %10 : vector<2x64xf32>
    %cst_8 = arith.constant 1.000000e+00 : f32
    %12 = vector.broadcast %cst_8 : f32 to vector<2x64xf32>
    %13 = arith.addf %12, %11 : vector<2x64xf32>
    %14 = arith.divf %12, %13 : vector<2x64xf32>
    %15 = vector.extract_strided_slice %8 {offsets = [0, 64], sizes = [2, 32], strides = [1, 1]} : vector<2x128xf32> to vector<2x32xf32>
    %16 = math.tanh %15 : vector<2x32xf32>
    %17 = vector.extract_strided_slice %8 {offsets = [0, 96], sizes = [2, 32], strides = [1, 1]} : vector<2x128xf32> to vector<2x32xf32>
    %18 = arith.negf %17 : vector<2x32xf32>
    %19 = math.exp %18 : vector<2x32xf32>
    %cst_9 = arith.constant 1.000000e+00 : f32
    %20 = vector.broadcast %cst_9 : f32 to vector<2x32xf32>
    %21 = arith.addf %20, %19 : vector<2x32xf32>
    %22 = arith.divf %20, %21 : vector<2x32xf32>
    %23 = vector.extract_strided_slice %14 {offsets = [0, 0], sizes = [2, 32], strides = [1, 1]} : vector<2x64xf32> to vector<2x32xf32>
    %24 = vector.extract_strided_slice %14 {offsets = [0, 32], sizes = [2, 32], strides = [1, 1]} : vector<2x64xf32> to vector<2x32xf32>
    %25 = arith.mulf %24, %5 : vector<2x32xf32>
    %26 = arith.mulf %23, %16 : vector<2x32xf32>
    %27 = arith.addf %25, %26 : vector<2x32xf32>
    %28 = math.tanh %27 : vector<2x32xf32>
    %29 = arith.mulf %22, %28 : vector<2x32xf32>
    %30 = vector.extract_strided_slice %2 {offsets = [2, 0], sizes = [2, 128], strides = [1, 1]} : vector<16x128xf32> to vector<2x128xf32>
    %cst_10 = arith.constant dense<0.000000e+00> : vector<2x128xf32>
    %31 = tpu.matmul %29, %3, %cst_10 {dimension_numbers = #tpu.dot_dimension_numbers<[1], [0], [0], [1], [0, 0, 1, 1], [], []>} : vector<2x32xf32>, vector<32x128xf32>, vector<2x128xf32> -> vector<2x128xf32>
    %32 = arith.addf %30, %31 : vector<2x128xf32>
    %33 = vector.extract_strided_slice %32 {offsets = [0, 0], sizes = [2, 64], strides = [1, 1]} : vector<2x128xf32> to vector<2x64xf32>
    %34 = arith.negf %33 : vector<2x64xf32>
    %35 = math.exp %34 : vector<2x64xf32>
    %cst_11 = arith.constant 1.000000e+00 : f32
    %36 = vector.broadcast %cst_11 : f32 to vector<2x64xf32>
    %37 = arith.addf %36, %35 : vector<2x64xf32>
    %38 = arith.divf %36, %37 : vector<2x64xf32>
    %39 = vector.extract_strided_slice %32 {offsets = [0, 64], sizes = [2, 32], strides = [1, 1]} : vector<2x128xf32> to vector<2x32xf32>
    %40 = math.tanh %39 : vector<2x32xf32>
    %41 = vector.extract_strided_slice %32 {offsets = [0, 96], sizes = [2, 32], strides = [1, 1]} : vector<2x128xf32> to vector<2x32xf32>
    %42 = arith.negf %41 : vector<2x32xf32>
    %43 = math.exp %42 : vector<2x32xf32>
    %cst_12 = arith.constant 1.000000e+00 : f32
    %44 = vector.broadcast %cst_12 : f32 to vector<2x32xf32>
    %45 = arith.addf %44, %43 : vector<2x32xf32>
    %46 = arith.divf %44, %45 : vector<2x32xf32>
    %47 = vector.extract_strided_slice %38 {offsets = [0, 0], sizes = [2, 32], strides = [1, 1]} : vector<2x64xf32> to vector<2x32xf32>
    %48 = vector.extract_strided_slice %38 {offsets = [0, 32], sizes = [2, 32], strides = [1, 1]} : vector<2x64xf32> to vector<2x32xf32>
    %49 = arith.mulf %48, %27 : vector<2x32xf32>
    %50 = arith.mulf %47, %40 : vector<2x32xf32>
    %51 = arith.addf %49, %50 : vector<2x32xf32>
    %52 = math.tanh %51 : vector<2x32xf32>
    %53 = arith.mulf %46, %52 : vector<2x32xf32>
    %54 = vector.extract_strided_slice %2 {offsets = [4, 0], sizes = [2, 128], strides = [1, 1]} : vector<16x128xf32> to vector<2x128xf32>
    %cst_13 = arith.constant dense<0.000000e+00> : vector<2x128xf32>
    %55 = tpu.matmul %53, %3, %cst_13 {dimension_numbers = #tpu.dot_dimension_numbers<[1], [0], [0], [1], [0, 0, 1, 1], [], []>} : vector<2x32xf32>, vector<32x128xf32>, vector<2x128xf32> -> vector<2x128xf32>
    %56 = arith.addf %54, %55 : vector<2x128xf32>
    %57 = vector.extract_strided_slice %56 {offsets = [0, 0], sizes = [2, 64], strides = [1, 1]} : vector<2x128xf32> to vector<2x64xf32>
    %58 = arith.negf %57 : vector<2x64xf32>
    %59 = math.exp %58 : vector<2x64xf32>
    %cst_14 = arith.constant 1.000000e+00 : f32
    %60 = vector.broadcast %cst_14 : f32 to vector<2x64xf32>
    %61 = arith.addf %60, %59 : vector<2x64xf32>
    %62 = arith.divf %60, %61 : vector<2x64xf32>
    %63 = vector.extract_strided_slice %56 {offsets = [0, 64], sizes = [2, 32], strides = [1, 1]} : vector<2x128xf32> to vector<2x32xf32>
    %64 = math.tanh %63 : vector<2x32xf32>
    %65 = vector.extract_strided_slice %56 {offsets = [0, 96], sizes = [2, 32], strides = [1, 1]} : vector<2x128xf32> to vector<2x32xf32>
    %66 = arith.negf %65 : vector<2x32xf32>
    %67 = math.exp %66 : vector<2x32xf32>
    %cst_15 = arith.constant 1.000000e+00 : f32
    %68 = vector.broadcast %cst_15 : f32 to vector<2x32xf32>
    %69 = arith.addf %68, %67 : vector<2x32xf32>
    %70 = arith.divf %68, %69 : vector<2x32xf32>
    %71 = vector.extract_strided_slice %62 {offsets = [0, 0], sizes = [2, 32], strides = [1, 1]} : vector<2x64xf32> to vector<2x32xf32>
    %72 = vector.extract_strided_slice %62 {offsets = [0, 32], sizes = [2, 32], strides = [1, 1]} : vector<2x64xf32> to vector<2x32xf32>
    %73 = arith.mulf %72, %51 : vector<2x32xf32>
    %74 = arith.mulf %71, %64 : vector<2x32xf32>
    %75 = arith.addf %73, %74 : vector<2x32xf32>
    %76 = math.tanh %75 : vector<2x32xf32>
    %77 = arith.mulf %70, %76 : vector<2x32xf32>
    %78 = vector.extract_strided_slice %2 {offsets = [6, 0], sizes = [2, 128], strides = [1, 1]} : vector<16x128xf32> to vector<2x128xf32>
    %cst_16 = arith.constant dense<0.000000e+00> : vector<2x128xf32>
    %79 = tpu.matmul %77, %3, %cst_16 {dimension_numbers = #tpu.dot_dimension_numbers<[1], [0], [0], [1], [0, 0, 1, 1], [], []>} : vector<2x32xf32>, vector<32x128xf32>, vector<2x128xf32> -> vector<2x128xf32>
    %80 = arith.addf %78, %79 : vector<2x128xf32>
    %81 = vector.extract_strided_slice %80 {offsets = [0, 0], sizes = [2, 64], strides = [1, 1]} : vector<2x128xf32> to vector<2x64xf32>
    %82 = arith.negf %81 : vector<2x64xf32>
    %83 = math.exp %82 : vector<2x64xf32>
    %cst_17 = arith.constant 1.000000e+00 : f32
    %84 = vector.broadcast %cst_17 : f32 to vector<2x64xf32>
    %85 = arith.addf %84, %83 : vector<2x64xf32>
    %86 = arith.divf %84, %85 : vector<2x64xf32>
    %87 = vector.extract_strided_slice %80 {offsets = [0, 64], sizes = [2, 32], strides = [1, 1]} : vector<2x128xf32> to vector<2x32xf32>
    %88 = math.tanh %87 : vector<2x32xf32>
    %89 = vector.extract_strided_slice %80 {offsets = [0, 96], sizes = [2, 32], strides = [1, 1]} : vector<2x128xf32> to vector<2x32xf32>
    %90 = arith.negf %89 : vector<2x32xf32>
    %91 = math.exp %90 : vector<2x32xf32>
    %cst_18 = arith.constant 1.000000e+00 : f32
    %92 = vector.broadcast %cst_18 : f32 to vector<2x32xf32>
    %93 = arith.addf %92, %91 : vector<2x32xf32>
    %94 = arith.divf %92, %93 : vector<2x32xf32>
    %95 = vector.extract_strided_slice %86 {offsets = [0, 0], sizes = [2, 32], strides = [1, 1]} : vector<2x64xf32> to vector<2x32xf32>
    %96 = vector.extract_strided_slice %86 {offsets = [0, 32], sizes = [2, 32], strides = [1, 1]} : vector<2x64xf32> to vector<2x32xf32>
    %97 = arith.mulf %96, %75 : vector<2x32xf32>
    %98 = arith.mulf %95, %88 : vector<2x32xf32>
    %99 = arith.addf %97, %98 : vector<2x32xf32>
    %100 = math.tanh %99 : vector<2x32xf32>
    %101 = arith.mulf %94, %100 : vector<2x32xf32>
    %102 = vector.extract_strided_slice %2 {offsets = [8, 0], sizes = [2, 128], strides = [1, 1]} : vector<16x128xf32> to vector<2x128xf32>
    %cst_19 = arith.constant dense<0.000000e+00> : vector<2x128xf32>
    %103 = tpu.matmul %101, %3, %cst_19 {dimension_numbers = #tpu.dot_dimension_numbers<[1], [0], [0], [1], [0, 0, 1, 1], [], []>} : vector<2x32xf32>, vector<32x128xf32>, vector<2x128xf32> -> vector<2x128xf32>
    %104 = arith.addf %102, %103 : vector<2x128xf32>
    %105 = vector.extract_strided_slice %104 {offsets = [0, 0], sizes = [2, 64], strides = [1, 1]} : vector<2x128xf32> to vector<2x64xf32>
    %106 = arith.negf %105 : vector<2x64xf32>
    %107 = math.exp %106 : vector<2x64xf32>
    %cst_20 = arith.constant 1.000000e+00 : f32
    %108 = vector.broadcast %cst_20 : f32 to vector<2x64xf32>
    %109 = arith.addf %108, %107 : vector<2x64xf32>
    %110 = arith.divf %108, %109 : vector<2x64xf32>
    %111 = vector.extract_strided_slice %104 {offsets = [0, 64], sizes = [2, 32], strides = [1, 1]} : vector<2x128xf32> to vector<2x32xf32>
    %112 = math.tanh %111 : vector<2x32xf32>
    %113 = vector.extract_strided_slice %104 {offsets = [0, 96], sizes = [2, 32], strides = [1, 1]} : vector<2x128xf32> to vector<2x32xf32>
    %114 = arith.negf %113 : vector<2x32xf32>
    %115 = math.exp %114 : vector<2x32xf32>
    %cst_21 = arith.constant 1.000000e+00 : f32
    %116 = vector.broadcast %cst_21 : f32 to vector<2x32xf32>
    %117 = arith.addf %116, %115 : vector<2x32xf32>
    %118 = arith.divf %116, %117 : vector<2x32xf32>
    %119 = vector.extract_strided_slice %110 {offsets = [0, 0], sizes = [2, 32], strides = [1, 1]} : vector<2x64xf32> to vector<2x32xf32>
    %120 = vector.extract_strided_slice %110 {offsets = [0, 32], sizes = [2, 32], strides = [1, 1]} : vector<2x64xf32> to vector<2x32xf32>
    %121 = arith.mulf %120, %99 : vector<2x32xf32>
    %122 = arith.mulf %119, %112 : vector<2x32xf32>
    %123 = arith.addf %121, %122 : vector<2x32xf32>
    %124 = math.tanh %123 : vector<2x32xf32>
    %125 = arith.mulf %118, %124 : vector<2x32xf32>
    %126 = vector.extract_strided_slice %2 {offsets = [10, 0], sizes = [2, 128], strides = [1, 1]} : vector<16x128xf32> to vector<2x128xf32>
    %cst_22 = arith.constant dense<0.000000e+00> : vector<2x128xf32>
    %127 = tpu.matmul %125, %3, %cst_22 {dimension_numbers = #tpu.dot_dimension_numbers<[1], [0], [0], [1], [0, 0, 1, 1], [], []>} : vector<2x32xf32>, vector<32x128xf32>, vector<2x128xf32> -> vector<2x128xf32>
    %128 = arith.addf %126, %127 : vector<2x128xf32>
    %129 = vector.extract_strided_slice %128 {offsets = [0, 0], sizes = [2, 64], strides = [1, 1]} : vector<2x128xf32> to vector<2x64xf32>
    %130 = arith.negf %129 : vector<2x64xf32>
    %131 = math.exp %130 : vector<2x64xf32>
    %cst_23 = arith.constant 1.000000e+00 : f32
    %132 = vector.broadcast %cst_23 : f32 to vector<2x64xf32>
    %133 = arith.addf %132, %131 : vector<2x64xf32>
    %134 = arith.divf %132, %133 : vector<2x64xf32>
    %135 = vector.extract_strided_slice %128 {offsets = [0, 64], sizes = [2, 32], strides = [1, 1]} : vector<2x128xf32> to vector<2x32xf32>
    %136 = math.tanh %135 : vector<2x32xf32>
    %137 = vector.extract_strided_slice %128 {offsets = [0, 96], sizes = [2, 32], strides = [1, 1]} : vector<2x128xf32> to vector<2x32xf32>
    %138 = arith.negf %137 : vector<2x32xf32>
    %139 = math.exp %138 : vector<2x32xf32>
    %cst_24 = arith.constant 1.000000e+00 : f32
    %140 = vector.broadcast %cst_24 : f32 to vector<2x32xf32>
    %141 = arith.addf %140, %139 : vector<2x32xf32>
    %142 = arith.divf %140, %141 : vector<2x32xf32>
    %143 = vector.extract_strided_slice %134 {offsets = [0, 0], sizes = [2, 32], strides = [1, 1]} : vector<2x64xf32> to vector<2x32xf32>
    %144 = vector.extract_strided_slice %134 {offsets = [0, 32], sizes = [2, 32], strides = [1, 1]} : vector<2x64xf32> to vector<2x32xf32>
    %145 = arith.mulf %144, %123 : vector<2x32xf32>
    %146 = arith.mulf %143, %136 : vector<2x32xf32>
    %147 = arith.addf %145, %146 : vector<2x32xf32>
    %148 = math.tanh %147 : vector<2x32xf32>
    %149 = arith.mulf %142, %148 : vector<2x32xf32>
    %150 = vector.extract_strided_slice %2 {offsets = [12, 0], sizes = [2, 128], strides = [1, 1]} : vector<16x128xf32> to vector<2x128xf32>
    %cst_25 = arith.constant dense<0.000000e+00> : vector<2x128xf32>
    %151 = tpu.matmul %149, %3, %cst_25 {dimension_numbers = #tpu.dot_dimension_numbers<[1], [0], [0], [1], [0, 0, 1, 1], [], []>} : vector<2x32xf32>, vector<32x128xf32>, vector<2x128xf32> -> vector<2x128xf32>
    %152 = arith.addf %150, %151 : vector<2x128xf32>
    %153 = vector.extract_strided_slice %152 {offsets = [0, 0], sizes = [2, 64], strides = [1, 1]} : vector<2x128xf32> to vector<2x64xf32>
    %154 = arith.negf %153 : vector<2x64xf32>
    %155 = math.exp %154 : vector<2x64xf32>
    %cst_26 = arith.constant 1.000000e+00 : f32
    %156 = vector.broadcast %cst_26 : f32 to vector<2x64xf32>
    %157 = arith.addf %156, %155 : vector<2x64xf32>
    %158 = arith.divf %156, %157 : vector<2x64xf32>
    %159 = vector.extract_strided_slice %152 {offsets = [0, 64], sizes = [2, 32], strides = [1, 1]} : vector<2x128xf32> to vector<2x32xf32>
    %160 = math.tanh %159 : vector<2x32xf32>
    %161 = vector.extract_strided_slice %152 {offsets = [0, 96], sizes = [2, 32], strides = [1, 1]} : vector<2x128xf32> to vector<2x32xf32>
    %162 = arith.negf %161 : vector<2x32xf32>
    %163 = math.exp %162 : vector<2x32xf32>
    %cst_27 = arith.constant 1.000000e+00 : f32
    %164 = vector.broadcast %cst_27 : f32 to vector<2x32xf32>
    %165 = arith.addf %164, %163 : vector<2x32xf32>
    %166 = arith.divf %164, %165 : vector<2x32xf32>
    %167 = vector.extract_strided_slice %158 {offsets = [0, 0], sizes = [2, 32], strides = [1, 1]} : vector<2x64xf32> to vector<2x32xf32>
    %168 = vector.extract_strided_slice %158 {offsets = [0, 32], sizes = [2, 32], strides = [1, 1]} : vector<2x64xf32> to vector<2x32xf32>
    %169 = arith.mulf %168, %147 : vector<2x32xf32>
    %170 = arith.mulf %167, %160 : vector<2x32xf32>
    %171 = arith.addf %169, %170 : vector<2x32xf32>
    %172 = math.tanh %171 : vector<2x32xf32>
    %173 = arith.mulf %166, %172 : vector<2x32xf32>
    %174 = vector.extract_strided_slice %2 {offsets = [14, 0], sizes = [2, 128], strides = [1, 1]} : vector<16x128xf32> to vector<2x128xf32>
    %cst_28 = arith.constant dense<0.000000e+00> : vector<2x128xf32>
    %175 = tpu.matmul %173, %3, %cst_28 {dimension_numbers = #tpu.dot_dimension_numbers<[1], [0], [0], [1], [0, 0, 1, 1], [], []>} : vector<2x32xf32>, vector<32x128xf32>, vector<2x128xf32> -> vector<2x128xf32>
    %176 = arith.addf %174, %175 : vector<2x128xf32>
    %177 = vector.extract_strided_slice %176 {offsets = [0, 0], sizes = [2, 64], strides = [1, 1]} : vector<2x128xf32> to vector<2x64xf32>
    %178 = arith.negf %177 : vector<2x64xf32>
    %179 = math.exp %178 : vector<2x64xf32>
    %cst_29 = arith.constant 1.000000e+00 : f32
    %180 = vector.broadcast %cst_29 : f32 to vector<2x64xf32>
    %181 = arith.addf %180, %179 : vector<2x64xf32>
    %182 = arith.divf %180, %181 : vector<2x64xf32>
    %183 = vector.extract_strided_slice %176 {offsets = [0, 64], sizes = [2, 32], strides = [1, 1]} : vector<2x128xf32> to vector<2x32xf32>
    %184 = math.tanh %183 : vector<2x32xf32>
    %185 = vector.extract_strided_slice %176 {offsets = [0, 96], sizes = [2, 32], strides = [1, 1]} : vector<2x128xf32> to vector<2x32xf32>
    %186 = arith.negf %185 : vector<2x32xf32>
    %187 = math.exp %186 : vector<2x32xf32>
    %cst_30 = arith.constant 1.000000e+00 : f32
    %188 = vector.broadcast %cst_30 : f32 to vector<2x32xf32>
    %189 = arith.addf %188, %187 : vector<2x32xf32>
    %190 = arith.divf %188, %189 : vector<2x32xf32>
    %191 = vector.extract_strided_slice %182 {offsets = [0, 0], sizes = [2, 32], strides = [1, 1]} : vector<2x64xf32> to vector<2x32xf32>
    %192 = vector.extract_strided_slice %182 {offsets = [0, 32], sizes = [2, 32], strides = [1, 1]} : vector<2x64xf32> to vector<2x32xf32>
    %193 = arith.mulf %192, %171 : vector<2x32xf32>
    %194 = arith.mulf %191, %184 : vector<2x32xf32>
    %195 = arith.addf %193, %194 : vector<2x32xf32>
    %196 = math.tanh %195 : vector<2x32xf32>
    %197 = arith.mulf %190, %196 : vector<2x32xf32>
    %c0_31 = arith.constant 0 : index
    %c0_32 = arith.constant 0 : index
    %198 = vector.load %arg3[%c0_31, %c0_32] : memref<2x32xf32, #tpu.memory_space<vmem>>, vector<2x32xf32>
    tpu.vector_store %arg3[%c0_31, %c0_32], %197 {strides = array<i32>} : memref<2x32xf32, #tpu.memory_space<vmem>>, vector<2x32xf32>,
    return
  }
}

</mosaic_0001>

<bundles_post_ra>
// kernel: tpu_custom_call.1
= control target key start
LH: loop header
LB: loop body
LE: loop exit
PB: predicated region body
PF: predicated region fallthrough
CT: control target
= control target key end

     0   :  { %8 = vsyncpa [#allocation3], 0  ;;  %s1589_s0 = inlined_call_operand.hbm [shape: f32[16,16], index: 0, kind: input, shape index: {}]   ;;  %s1590_s1 = inlined_call_operand.hbm [shape: f32[16,128], index: 1, kind: input, shape index: {}]   ;;  %s1591_s2 = inlined_call_operand.hbm [shape: f32[32,128], index: 2, kind: input, shape index: {}]   ;;  %s1592_s3 = inlined_call_operand.hbm [shape: f32[2,32], index: 3, kind: output, shape index: {}]  }
   0x1   :  { %9 = vsyncpa [#allocation6], 0 }
   0x2   :  { %10 = vsyncpa [#allocation4], 0  ;;  %s1388_s12 = smov [#allocation5]   ;;  %s1389_s14 = smov [#allocation2]  }
   0x3   :  { %s28_s13 = sshll.u32 %s1388_s12, 4  ;;  %s16_s15 = sshll.u32 %s1389_s14, 4  ;;  %s29_s13 = int_to_ptr.vmem [resolvable:$true] %s28_s13  ;;  %s1419_s15 = int_to_ptr.vmem [resolvable:$true] %s16_s15 }
   0x4   :  { %s1294_s18 = scalar_lea.hbm %s1590_s1, 256 }
   0x5   :  { %p1295_p0 = scmp.ne.s32.totalorder %s1590_s1, %s1294_s18  ;;  %p1298_p1 = scmp.lt.u32.totalorder %s1294_s18, %s1590_s1 }
   0x7   :  { %p1300_p2 = pnand %p1298_p1, %p1295_p0 }
   0x9   :  { %1303 = shalt.err (!%p1300_p2)
}
   0xa   :  { %s1304_s23 = scalar_lea.vmem %s29_s13, 256  ;;  %p1309_p4 = scmp.lt.s32.totalorder %s29_s13, %s29_s13 }
   0xb   :  { %p1305_p3 = scmp.ne.s32.totalorder %s29_s13, %s1304_s23  ;;  %p1310_p5 = scmp.lt.s32.totalorder %s1304_s23, %s1304_s23 }
   0xd   :  { %p1311_p6 = por %p1310_p5, %p1309_p4 }
   0xf   :  { %p1312_p7 = pnand %p1311_p6, %p1305_p3 }
  0x11   :  { %1315 = shalt.err (!%p1312_p7)
}
  0x12   :  { %s1390_s24 = smov 128   ;;  %s1391_s25 = smov 8  }
  0x13   :  { %34 = dma.hbm_to_vmem [thread:$0]  %s1590_s1, 256, %s29_s13, [#allocation6], %s1390_s24, %s1390_s24, %s1391_s25  }
  0x14   :  { %s1316_s30 = scalar_lea.hbm %s1589_s0, 256 }
  0x15   :  { %p1317_p8 = scmp.ne.s32.totalorder %s1589_s0, %s1316_s30  ;;  %p1320_p9 = scmp.lt.u32.totalorder %s1316_s30, %s1589_s0 }
  0x17   :  { %p1322_p10 = pnand %p1320_p9, %p1317_p8 }
  0x19   :  { %1325 = shalt.err (!%p1322_p10)
}
  0x1a   :  { %s1326_s8 = scalar_lea.vmem %s1419_s15, 256  ;;  %p1331_p12 = scmp.lt.s32.totalorder %s1419_s15, %s1419_s15 }
  0x1b   :  { %p1327_p11 = scmp.ne.s32.totalorder %s1419_s15, %s1326_s8  ;;  %p1332_p13 = scmp.lt.s32.totalorder %s1326_s8, %s1326_s8 }
  0x1d   :  { %p1333_p0 = por %p1332_p13, %p1331_p12 }
  0x1f   :  { %p1334_p1 = pnand %p1333_p0, %p1327_p11 }
  0x21   :  { %1337 = shalt.err (!%p1334_p1)
}
  0x22   :  { %22 = dma.hbm_to_vmem [thread:$0]  %s1589_s0, 256, %s1419_s15, [#allocation3], %s1390_s24, %s1390_s24, %s1391_s25  }
  0x23   :  { %s1392_s10 = smov [#allocation7]   ;;  %s1338_s14 = scalar_lea.hbm %s1591_s2, 512 }
  0x24   :  { %s40_s11 = sshll.u32 %s1392_s10, 4  ;;  %p1339_p2 = scmp.ne.s32.totalorder %s1591_s2, %s1338_s14  ;;  %s41_s11 = int_to_ptr.vmem [resolvable:$true] %s40_s11 }
  0x25   :  { %p1342_p3 = scmp.lt.u32.totalorder %s1338_s14, %s1591_s2 }
  0x27   :  { %p1344_p4 = pnand %p1342_p3, %p1339_p2 }
  0x29   :  { %1347 = shalt.err (!%p1344_p4)
}
  0x2a   :  { %s1348_s20 = scalar_lea.vmem %s41_s11, 512  ;;  %p1353_p6 = scmp.lt.s32.totalorder %s41_s11, %s41_s11 }
  0x2b   :  { %p1349_p5 = scmp.ne.s32.totalorder %s41_s11, %s1348_s20  ;;  %p1354_p7 = scmp.lt.s32.totalorder %s1348_s20, %s1348_s20 }
  0x2d   :  { %p1355_p8 = por %p1354_p7, %p1353_p6 }
  0x2f   :  { %p1356_p9 = pnand %p1355_p8, %p1349_p5 }
  0x31   :  { %1359 = shalt.err (!%p1356_p9)
}
  0x32   :  { %46 = dma.hbm_to_vmem [thread:$0]  %s1591_s2, 512, %s41_s11, [#allocation6], %s1390_s24, %s1390_s24, %s1391_s25  }
  0x33   :  { %1382 = dma.done.wait [#allocation3], 256  }
  0x34   :  { %1383 = vsyncadd [#allocation3], 4294967040 }
  0x35   :  { %1384 = dma.done.wait [#allocation6], 768  }
  0x36   :  { %1385 = vsyncadd [#allocation6], 4294966528  ;;  %v1393_v0 = vmov 0.0|0.0   ;;  %vm1394_vm0 = vmmov 0   ;;  %v1395_v1 = vmov 0.0   ;;  %vm60_vm1 = vcmask 130048  }
  0x37   :  { %1171 = vmatprep.subr.bf16.mxu1 %v1393_v0  ;;  %1087 = vmatprep.mubr.msk.f32.mxu1 %vm1394_vm0, %v1395_v1  ;;  %v142_v2 = vld [vmem:[#allocation7] sm:$0xff]  ;;  %v143_v3 = vld [vmem:[#allocation7 + $0x8] sm:$0xff]  ;;  %v58_v4 = vld [vmem:[#allocation5] sm:$0xff]  ;;  %s1396_s2 = smov 64   ;;  %s1397_s21 = smov 32   ;;  %vm146_vm2 = vcmask 261120  }
  0x38   :  { %v1474_v5 = vpack.c.bf16 %v143_v3, %v142_v2  ;;  %v59_v6 = vld [vmem:[#allocation5 + $0x8] sm:$0xff]  ;;  %v56_v7 = vld [vmem:[#allocation2] sm:$0xff]  ;;  %v144_v8 = vld [vmem:[#allocation7 + $0x10] sm:$0xff]  ;;  %s1398_s22 = smov [#allocation8]   ;;  %vm993_vm3 = vcmask 261126  }
  0x39   :  { %v1167_v9 = vpack.c.bf16 %v59_v6, %v58_v4  ;;  %1076 = vmatprep.mubr.msk.f32.mxu0 %vm60_vm1, %v56_v7  ;;  %v145_v10 = vld [vmem:[#allocation7 + $0x18] sm:$0xff]  ;;  %v57_v12 = vld [vmem:[#allocation2 + $0x8] sm:$0xff]  ;;  %s1001_s23 = sshll.u32 %s1398_s22, 4  ;;  %s1002_s23 = int_to_ptr.vmem [resolvable:$true] %s1001_s23 }
  0x3a   :  { %1173 = vmatpush3.bf16.msra.mxu1 %v1474_v5  ;;  %v1478_v11 = vpack.c.bf16 %v145_v10, %v144_v8  ;;  %s1360_s24 = scalar_lea.vmem %s1002_s23, 32  ;;  %p1365_p11 = scmp.lt.s32.totalorder %s1002_s23, %s1002_s23 }
  0x3b   :  { %1168 = vmatprep.subr.bf16.mxu0 %v1167_v9  ;;  %1174 = vmatprep.subr.bf16.mxu1 %v1393_v0  ;;  %p1361_p10 = scmp.ne.s32.totalorder %s1002_s23, %s1360_s24  ;;  %p1366_p12 = scmp.lt.s32.totalorder %s1360_s24, %s1360_s24 }
  0x3c   :  { %1170 = vmatpush3.bf16.msra.mxu0 %v1167_v9 }
  0x3d   :  { %1177 = vmatprep.subr.bf16.mxu0 %v1393_v0  ;;  %p1367_p13 = por %p1366_p12, %p1365_p11 }
  0x3e   :  { %1176 = vmatpush3.bf16.msra.mxu1 %v1478_v11 }
  0x3f   :  { %1077 = vmatmul.mubr.msk.f32.vlgmr.msra.gmra.mrb[0].mxu0 %vm60_vm1, %v57_v12  ;;  %1183 = vmatprep.subr.bf16.mxu1 %v1393_v0  ;;  %p1368_p0 = pnand %p1367_p13, %p1361_p10 }
  0x40   :  { %1179 = vmatpush3.bf16.msra.mxu0 %v1474_v5  ;;  %1098 = vmatprep.mubr.msk.f32.mxu0 %vm1394_vm0, %v1395_v1 }
  0x41   :  { %1088 = vmatmul.mubr.f32.vlgmr.msra.gmra.mrb[0].mxu1 %v1395_v1  ;;  %1180 = vmatprep.subr.bf16.mxu0 %v1393_v0 }
  0x42   :  { %1185 = vmatpush3.bf16.msra.mxu1 %v1474_v5  ;;  %1109 = vmatprep.mubr.msk.f32.mxu1 %vm1394_vm0, %v1395_v1 }
  0x43   :  { %1186 = vmatprep.subr.bf16.mxu1 %v1393_v0 }
  0x44   :  { %1182 = vmatpush3.bf16.msra.mxu0 %v1478_v11 }
  0x45   :  { %1189 = vmatprep.subr.bf16.mxu0 %v1393_v0 }
  0x46   :  { %1188 = vmatpush3.bf16.msra.mxu1 %v1478_v11 }
  0x47   :  { %1195 = vmatprep.subr.bf16.mxu1 %v1393_v0 }
 0x112   :  { %v1498_v13 = vpop.f32.mrb[0].mxu0 }
 0x113   :  { %v1500_v14 = vpop.f32.mrb[1].mxu0 }
 0x114   :  { %v216_v15 = vpop.f32.mrb[0].mxu1 }
 0x115   :  { %v220_v16 = vadd.f32 %v216_v15, %v1500_v14  ;;  %v1089_v17 = vpop.f32.mrb[1].mxu1 }
 0x117   :  { %1230 = vtanh.f32 %v220_v16  ;;  %v1013_v19 = vmul.f32 -1.442695, %v220_v16 }
 0x119   :  { %1232 = vpow2.f32 %v1013_v19 }
 0x121   :  { %v1231_v18 = vpop.eup %1230 }
 0x122   :  { %230 = vrot.lane.b32.xlu0 %v1231_v18, %s1396_s2 }
 0x123   :  { %v1233_v20 = vpop.eup %1232 }
 0x124   :  { %v224_v21 = vadd.f32 1.0, %v1233_v20 }
 0x126   :  { %1234 = vrcp.f32 %v224_v21 }
 0x130   :  { %v1235_v22 = vpop.eup %1234 }
 0x131   :  { %v228_v25 = vmul.f32 0.0, %v1235_v22 }
 0x194   :  { %v231_v23 = vpop.permute.xlu0 %230 }
 0x195   :  { %v233_v24 = vmul.f32 %v1235_v22, %v231_v23 }
 0x197   :  { %235 = vrot.lane.b32.xlu0 %v233_v24, %s1397_s21 }
 0x209   :  { %v236_v26 = vpop.permute.xlu0 %235 }
 0x20a   :  { %v238_v27 = vadd.f32 %v236_v26, %v228_v25 }
 0x20c   :  { %1236 = vtanh.f32 %v238_v27  ;;  %v332_v43 = vrot.slane %v238_v27, 6 }
 0x216   :  { %v1237_v28 = vpop.eup %1236 }
 0x217   :  { %241 = vrot.lane.b32.xlu1 %v1237_v28, %s1396_s2 }
 0x289   :  { %v242_v29 = vpop.permute.xlu1 %241 }
 0x28a   :  { %v244_v30 = vmul.f32 %v1235_v22, %v242_v29 }
 0x28c   :  { %246 = vrot.lane.b32.xlu1 %v244_v30, %s1397_s21 }
 0x2fe   :  { %v247_v31 = vpop.permute.xlu1 %246 }
 0x2ff   :  { %1099 = vmatmul.mubr.msk.f32.vlgmr.msra.gmra.mrb[2].mxu0 %vm146_vm2, %v247_v31 }
 0x300   :  { %1191 = vmatpush3.bf16.msra.mxu0 %v1474_v5  ;;  %1120 = vmatprep.mubr.msk.f32.mxu0 %vm1394_vm0, %v1395_v1 }
 0x301   :  { %1192 = vmatprep.subr.bf16.mxu0 %v1393_v0 }
 0x304   :  { %1194 = vmatpush3.bf16.msra.mxu0 %v1478_v11 }
 0x305   :  { %1201 = vmatprep.subr.bf16.mxu0 %v1393_v0 }
 0x3d2   :  { %v316_v32 = vpop.f32.mrb[2].mxu0 }
 0x3d3   :  { %v321_v33 = vrot.slane %v316_v32, 6  ;;  %v1100_v34 = vpop.f32.mrb[3].mxu0 }
 0x3d5   :  { %v323_v35 = vadd.f32 %v321_v33, %v1500_v14 }
 0x3d7   :  { %1238 = vtanh.f32 %v323_v35  ;;  %v1015_v37 = vmul.f32 -1.442695, %v323_v35 }
 0x3d9   :  { %1240 = vpow2.f32 %v1015_v37 }
 0x3e1   :  { %v1239_v36 = vpop.eup %1238 }
 0x3e2   :  { %336 = vrot.lane.b32.xlu0 %v1239_v36, %s1396_s2 }
 0x3e3   :  { %v1241_v38 = vpop.eup %1240 }
 0x3e4   :  { %v327_v39 = vadd.f32 1.0, %v1241_v38 }
 0x3e6   :  { %1242 = vrcp.f32 %v327_v39 }
 0x3f0   :  { %v1243_v40 = vpop.eup %1242 }
 0x3f1   :  { %v334_v44 = vmul.f32 %v1243_v40, %v332_v43 }
 0x454   :  { %v337_v41 = vpop.permute.xlu0 %336 }
 0x455   :  { %v339_v42 = vmul.f32 %v1243_v40, %v337_v41 }
 0x457   :  { %341 = vrot.lane.b32.xlu1 %v339_v42, %s1397_s21 }
 0x4c9   :  { %v342_v45 = vpop.permute.xlu1 %341 }
 0x4ca   :  { %v344_v46 = vadd.f32 %v342_v45, %v334_v44 }
 0x4cc   :  { %1244 = vtanh.f32 %v344_v46  ;;  %v439_v63 = vrot.slane %v344_v46, 6 }
 0x4d6   :  { %v1245_v47 = vpop.eup %1244 }
 0x4d7   :  { %347 = vrot.lane.b32.xlu0 %v1245_v47, %s1396_s2 }
 0x549   :  { %v348_v48 = vpop.permute.xlu0 %347 }
 0x54a   :  { %v350_v49 = vmul.f32 %v1243_v40, %v348_v48 }
 0x54c   :  { %v352_v50 = vrot.slane %v350_v49, 2 }
 0x54e   :  { %353 = vrot.lane.b32.xlu1 %v352_v50, %s1397_s21 }
 0x5c0   :  { %v354_v51 = vpop.permute.xlu1 %353 }
 0x5c1   :  { %1110 = vmatmul.mubr.msk.f32.vlgmr.msra.gmra.mrb[2].mxu1 %vm146_vm2, %v354_v51 }
 0x5c2   :  { %1197 = vmatpush3.bf16.msra.mxu1 %v1474_v5  ;;  %1131 = vmatprep.mubr.msk.f32.mxu1 %vm1394_vm0, %v1395_v1 }
 0x5c3   :  { %1198 = vmatprep.subr.bf16.mxu1 %v1393_v0 }
 0x5c6   :  { %1200 = vmatpush3.bf16.msra.mxu1 %v1478_v11 }
 0x5c7   :  { %1207 = vmatprep.subr.bf16.mxu1 %v1393_v0 }
 0x694   :  { %v423_v52 = vpop.f32.mrb[2].mxu1 }
 0x695   :  { %v428_v53 = vrot.slane %v423_v52, 4  ;;  %v1111_v54 = vpop.f32.mrb[3].mxu1 }
 0x697   :  { %v430_v55 = vadd.f32 %v428_v53, %v1500_v14 }
 0x699   :  { %1246 = vtanh.f32 %v430_v55  ;;  %v1017_v57 = vmul.f32 -1.442695, %v430_v55 }
 0x69b   :  { %1248 = vpow2.f32 %v1017_v57 }
 0x6a3   :  { %v1247_v56 = vpop.eup %1246 }
 0x6a4   :  { %443 = vrot.lane.b32.xlu0 %v1247_v56, %s1396_s2 }
 0x6a5   :  { %v1249_v58 = vpop.eup %1248 }
 0x6a6   :  { %v434_v59 = vadd.f32 1.0, %v1249_v58 }
 0x6a8   :  { %1250 = vrcp.f32 %v434_v59 }
 0x6b2   :  { %v1251_v60 = vpop.eup %1250 }
 0x6b3   :  { %v441_v2 = vmul.f32 %v1251_v60, %v439_v63 }
 0x716   :  { %v444_v61 = vpop.permute.xlu0 %443 }
 0x717   :  { %v446_v62 = vmul.f32 %v1251_v60, %v444_v61 }
 0x719   :  { %448 = vrot.lane.b32.xlu1 %v446_v62, %s1397_s21 }
 0x78b   :  { %v449_v3 = vpop.permute.xlu1 %448 }
 0x78c   :  { %v451_v4 = vadd.f32 %v449_v3, %v441_v2 }
 0x78e   :  { %1252 = vtanh.f32 %v451_v4  ;;  %v546_v25 = vrot.slane %v451_v4, 6 }
 0x798   :  { %v1253_v6 = vpop.eup %1252 }
 0x799   :  { %454 = vrot.lane.b32.xlu0 %v1253_v6, %s1396_s2 }
 0x80b   :  { %v455_v7 = vpop.permute.xlu0 %454 }
 0x80c   :  { %v457_v8 = vmul.f32 %v1251_v60, %v455_v7 }
 0x80e   :  { %v459_v9 = vrot.slane %v457_v8, 4 }
 0x810   :  { %460 = vrot.lane.b32.xlu1 %v459_v9, %s1397_s21 }
 0x882   :  { %v461_v10 = vpop.permute.xlu1 %460 }
 0x883   :  { %1121 = vmatmul.mubr.msk.f32.vlgmr.msra.gmra.mrb[4].mxu0 %vm146_vm2, %v461_v10 }
 0x884   :  { %1203 = vmatpush3.bf16.msra.mxu0 %v1474_v5  ;;  %1142 = vmatprep.mubr.msk.f32.mxu0 %vm1394_vm0, %v1395_v1 }
 0x885   :  { %1204 = vmatprep.subr.bf16.mxu0 %v1393_v0 }
 0x888   :  { %1206 = vmatpush3.bf16.msra.mxu0 %v1478_v11 }
 0x889   :  { %1213 = vmatprep.subr.bf16.mxu0 %v1393_v0 }
 0x956   :  { %v530_v12 = vpop.f32.mrb[4].mxu0 }
 0x957   :  { %v535_v15 = vrot.slane %v530_v12, 2  ;;  %v1122_v16 = vpop.f32.mrb[5].mxu0 }
 0x959   :  { %v537_v17 = vadd.f32 %v535_v15, %v1500_v14 }
 0x95b   :  { %1254 = vtanh.f32 %v537_v17  ;;  %v1019_v19 = vmul.f32 -1.442695, %v537_v17 }
 0x95d   :  { %1256 = vpow2.f32 %v1019_v19 }
 0x965   :  { %v1255_v18 = vpop.eup %1254 }
 0x966   :  { %550 = vrot.lane.b32.xlu0 %v1255_v18, %s1396_s2 }
 0x967   :  { %v1257_v20 = vpop.eup %1256 }
 0x968   :  { %v541_v21 = vadd.f32 1.0, %v1257_v20 }
 0x96a   :  { %1258 = vrcp.f32 %v541_v21 }
 0x974   :  { %v1259_v22 = vpop.eup %1258 }
 0x975   :  { %v548_v26 = vmul.f32 %v1259_v22, %v546_v25 }
 0x9d8   :  { %v551_v23 = vpop.permute.xlu0 %550 }
 0x9d9   :  { %v553_v24 = vmul.f32 %v1259_v22, %v551_v23 }
 0x9db   :  { %555 = vrot.lane.b32.xlu1 %v553_v24, %s1397_s21 }
 0xa4d   :  { %v556_v27 = vpop.permute.xlu1 %555 }
 0xa4e   :  { %v558_v28 = vadd.f32 %v556_v27, %v548_v26 }
 0xa50   :  { %1260 = vtanh.f32 %v558_v28  ;;  %v650_v43 = vrot.slane %v558_v28, 6 }
 0xa5a   :  { %v1261_v14 = vpop.eup %1260 }
 0xa5b   :  { %561 = vrot.lane.b32.xlu0 %v1261_v14, %s1396_s2 }
 0xacd   :  { %v562_v29 = vpop.permute.xlu0 %561 }
 0xace   :  { %v564_v30 = vmul.f32 %v1259_v22, %v562_v29 }
 0xad0   :  { %v566_v31 = vrot.slane %v564_v30, 6 }
 0xad2   :  { %567 = vrot.lane.b32.xlu1 %v566_v31, %s1397_s21 }
 0xb44   :  { %v568_v32 = vpop.permute.xlu1 %567 }
 0xb45   :  { %1132 = vmatmul.mubr.msk.f32.vlgmr.msra.gmra.mrb[4].mxu1 %vm146_vm2, %v568_v32 }
 0xb46   :  { %1209 = vmatpush3.bf16.msra.mxu1 %v1474_v5  ;;  %1153 = vmatprep.mubr.msk.f32.mxu1 %vm1394_vm0, %v1395_v1 }
 0xb47   :  { %1210 = vmatprep.subr.bf16.mxu1 %v1393_v0 }
 0xb4a   :  { %1212 = vmatpush3.bf16.msra.mxu1 %v1478_v11 }
 0xc18   :  { %v637_v33 = vpop.f32.mrb[4].mxu1 }
 0xc19   :  { %v641_v34 = vadd.f32 %v1498_v13, %v637_v33  ;;  %v1133_v35 = vpop.f32.mrb[5].mxu1 }
 0xc1b   :  { %1262 = vtanh.f32 %v641_v34  ;;  %v1021_v37 = vmul.f32 -1.442695, %v641_v34 }
 0xc1d   :  { %1264 = vpow2.f32 %v1021_v37 }
 0xc25   :  { %v1263_v36 = vpop.eup %1262 }
 0xc26   :  { %654 = vrot.lane.b32.xlu0 %v1263_v36, %s1396_s2 }
 0xc27   :  { %v1265_v38 = vpop.eup %1264 }
 0xc28   :  { %v645_v39 = vadd.f32 1.0, %v1265_v38 }
 0xc2a   :  { %1266 = vrcp.f32 %v645_v39 }
 0xc34   :  { %v1267_v40 = vpop.eup %1266 }
 0xc35   :  { %v652_v44 = vmul.f32 %v1267_v40, %v650_v43 }
 0xc98   :  { %v655_v41 = vpop.permute.xlu0 %654 }
 0xc99   :  { %v657_v42 = vmul.f32 %v1267_v40, %v655_v41 }
 0xc9b   :  { %659 = vrot.lane.b32.xlu1 %v657_v42, %s1397_s21 }
 0xd0d   :  { %v660_v45 = vpop.permute.xlu1 %659 }
 0xd0e   :  { %v662_v46 = vadd.f32 %v660_v45, %v652_v44 }
 0xd10   :  { %1268 = vtanh.f32 %v662_v46 }
 0xd1a   :  { %v1269_v47 = vpop.eup %1268 }
 0xd1b   :  { %665 = vrot.lane.b32.xlu0 %v1269_v47, %s1396_s2 }
 0xd8d   :  { %v666_v48 = vpop.permute.xlu0 %665 }
 0xd8e   :  { %v668_v49 = vmul.f32 %v1267_v40, %v666_v48 }
 0xd90   :  { %670 = vrot.lane.b32.xlu1 %v668_v49, %s1397_s21 }
 0xe02   :  { %v671_v50 = vpop.permute.xlu1 %670 }
 0xe03   :  { %1143 = vmatmul.mubr.msk.f32.vlgmr.msra.gmra.mrb[6].mxu0 %vm146_vm2, %v671_v50 }
 0xe04   :  { %1215 = vmatpush3.bf16.msra.mxu0 %v1474_v5  ;;  %1164 = vmatprep.mubr.msk.f32.mxu0 %vm1394_vm0, %v1395_v1 }
 0xe05   :  { %1216 = vmatprep.subr.bf16.mxu0 %v1393_v0  ;;  %v756_v0 = vrot.slane %v662_v46, 6 }
 0xe08   :  { %1218 = vmatpush3.bf16.msra.mxu0 %v1478_v11 }
 0xed6   :  { %v740_v51 = vpop.f32.mrb[6].mxu0 }
 0xed7   :  { %v745_v52 = vrot.slane %v740_v51, 6  ;;  %v1144_v53 = vpop.f32.mrb[7].mxu0 }
 0xed9   :  { %v747_v54 = vadd.f32 %v1498_v13, %v745_v52 }
 0xedb   :  { %1270 = vtanh.f32 %v747_v54  ;;  %v1023_v56 = vmul.f32 -1.442695, %v747_v54 }
 0xedd   :  { %1272 = vpow2.f32 %v1023_v56 }
 0xee5   :  { %v1271_v55 = vpop.eup %1270 }
 0xee6   :  { %760 = vrot.lane.b32.xlu0 %v1271_v55, %s1396_s2 }
 0xee7   :  { %v1273_v57 = vpop.eup %1272 }
 0xee8   :  { %v751_v5 = vadd.f32 1.0, %v1273_v57 }
 0xeea   :  { %1274 = vrcp.f32 %v751_v5 }
 0xef4   :  { %v1275_v58 = vpop.eup %1274 }
 0xef5   :  { %v758_v11 = vmul.f32 %v1275_v58, %v756_v0 }
 0xf58   :  { %v761_v1 = vpop.permute.xlu0 %760 }
 0xf59   :  { %v763_v59 = vmul.f32 %v1275_v58, %v761_v1 }
 0xf5b   :  { %765 = vrot.lane.b32.xlu1 %v763_v59, %s1397_s21 }
 0xfcd   :  { %v766_v60 = vpop.permute.xlu1 %765 }
 0xfce   :  { %v768_v61 = vadd.f32 %v766_v60, %v758_v11 }
 0xfd0   :  { %1276 = vtanh.f32 %v768_v61  ;;  %v863_v20 = vrot.slane %v768_v61, 6 }
 0xfda   :  { %v1277_v62 = vpop.eup %1276 }
 0xfdb   :  { %771 = vrot.lane.b32.xlu0 %v1277_v62, %s1396_s2 }
0x104d   :  { %v772_v63 = vpop.permute.xlu0 %771 }
0x104e   :  { %v774_v2 = vmul.f32 %v1275_v58, %v772_v63 }
0x1050   :  { %v776_v3 = vrot.slane %v774_v2, 2 }
0x1052   :  { %777 = vrot.lane.b32.xlu1 %v776_v3, %s1397_s21 }
0x10c4   :  { %v778_v4 = vpop.permute.xlu1 %777 }
0x10c5   :  { %1154 = vmatmul.mubr.msk.f32.vlgmr.msra.gmra.mrb[6].mxu1 %vm146_vm2, %v778_v4 }
0x1198   :  { %v847_v6 = vpop.f32.mrb[6].mxu1 }
0x1199   :  { %v852_v7 = vrot.slane %v847_v6, 4  ;;  %v1155_v8 = vpop.f32.mrb[7].mxu1 }
0x119b   :  { %v854_v9 = vadd.f32 %v1498_v13, %v852_v7 }
0x119d   :  { %1278 = vtanh.f32 %v854_v9  ;;  %v1025_v12 = vmul.f32 -1.442695, %v854_v9 }
0x119f   :  { %1280 = vpow2.f32 %v1025_v12 }
0x11a7   :  { %v1279_v10 = vpop.eup %1278 }
0x11a8   :  { %867 = vrot.lane.b32.xlu0 %v1279_v10, %s1396_s2 }
0x11a9   :  { %v1281_v15 = vpop.eup %1280 }
0x11aa   :  { %v858_v16 = vadd.f32 1.0, %v1281_v15 }
0x11ac   :  { %1282 = vrcp.f32 %v858_v16 }
0x11b6   :  { %v1283_v17 = vpop.eup %1282 }
0x11b7   :  { %v865_v21 = vmul.f32 %v1283_v17, %v863_v20 }
0x121a   :  { %v868_v18 = vpop.permute.xlu0 %867 }
0x121b   :  { %v870_v19 = vmul.f32 %v1283_v17, %v868_v18 }
0x121d   :  { %872 = vrot.lane.b32.xlu1 %v870_v19, %s1397_s21 }
0x128f   :  { %v873_v22 = vpop.permute.xlu1 %872 }
0x1290   :  { %v875_v23 = vadd.f32 %v873_v22, %v865_v21 }
0x1292   :  { %1284 = vtanh.f32 %v875_v23  ;;  %v970_v39 = vrot.slane %v875_v23, 6 }
0x129c   :  { %v1285_v24 = vpop.eup %1284 }
0x129d   :  { %878 = vrot.lane.b32.xlu0 %v1285_v24, %s1396_s2 }
0x130f   :  { %v879_v25 = vpop.permute.xlu0 %878 }
0x1310   :  { %v881_v26 = vmul.f32 %v1283_v17, %v879_v25 }
0x1312   :  { %v883_v27 = vrot.slane %v881_v26, 4 }
0x1314   :  { %884 = vrot.lane.b32.xlu1 %v883_v27, %s1397_s21 }
0x1386   :  { %v885_v28 = vpop.permute.xlu1 %884 }
0x1387   :  { %1165 = vmatmul.mubr.msk.f32.vlgmr.msra.gmra.mrb[8].mxu0 %vm146_vm2, %v885_v28 }
0x145a   :  { %v954_v14 = vpop.f32.mrb[8].mxu0 }
0x145b   :  { %v959_v29 = vrot.slane %v954_v14, 2  ;;  %v1166_v30 = vpop.f32.mrb[9].mxu0 }
0x145d   :  { %v961_v31 = vadd.f32 %v1498_v13, %v959_v29 }
0x145f   :  { %1286 = vtanh.f32 %v961_v31  ;;  %v1027_v33 = vmul.f32 -1.442695, %v961_v31 }
0x1461   :  { %1288 = vpow2.f32 %v1027_v33 }
0x1469   :  { %v1287_v32 = vpop.eup %1286 }
0x146a   :  { %974 = vrot.lane.b32.xlu0 %v1287_v32, %s1396_s2 }
0x146b   :  { %v1289_v34 = vpop.eup %1288 }
0x146c   :  { %v965_v35 = vadd.f32 1.0, %v1289_v34 }
0x146e   :  { %1290 = vrcp.f32 %v965_v35 }
0x1478   :  { %v1291_v36 = vpop.eup %1290 }
0x1479   :  { %v972_v40 = vmul.f32 %v1291_v36, %v970_v39 }
0x14dc   :  { %v975_v37 = vpop.permute.xlu0 %974 }
0x14dd   :  { %v977_v38 = vmul.f32 %v1291_v36, %v975_v37 }
0x14df   :  { %979 = vrot.lane.b32.xlu1 %v977_v38, %s1397_s21 }
0x1551   :  { %v980_v41 = vpop.permute.xlu1 %979 }
0x1552   :  { %v982_v42 = vadd.f32 %v980_v41, %v972_v40 }
0x1554   :  { %1292 = vtanh.f32 %v982_v42 }
0x155e   :  { %v1293_v13 = vpop.eup %1292 }
0x155f   :  { %985 = vrot.lane.b32.xlu0 %v1293_v13, %s1396_s2 }
0x15d1   :  { %v986_v43 = vpop.permute.xlu0 %985 }
0x15d2   :  { %v988_v44 = vmul.f32 %v1291_v36, %v986_v43 }
0x15d4   :  { %990 = vrot.lane.b32.xlu1 %v988_v44, %s1397_s21 }
0x1646   :  { %v991_v45 = vpop.permute.xlu1 %990 }
0x1647   :  { %994 = vst.msk [vmem:[#allocation8 - $0x6] sm:$0xc0] %vm993_vm3, %v991_v45 }
0x1648   :  { %1371 = shalt.err (!%p1368_p0)
}
0x1649   :  { %s1372_s27 = scalar_lea.hbm %s1592_s3, 32 }
0x164a   :  { %p1373_p1 = scmp.ne.s32.totalorder %s1592_s3, %s1372_s27  ;;  %p1376_p2 = scmp.lt.u32.totalorder %s1372_s27, %s1592_s3 }
0x164c   :  { %p1378_p3 = pnand %p1376_p2, %p1373_p1 }
0x164e   :  { %1381 = shalt.err (!%p1378_p3)
}
0x164f   :  { %1004 = dma.vmem_to_hbm [thread:$0]  %s1002_s23, 32, %s1592_s3, [#allocation4]  }
0x1650   :  { %1386 = dma.done.wait [#allocation4], 32  }
0x1651   :  { %1387 = vsyncadd [#allocation4], 4294967264 }
0x1652   :  { %1008 = vsyncpa [#allocation3], 1 }
0x1653   :  { %1009 = vsyncpa [#allocation6], 1 }
0x1654   :  { %1010 = vsyncpa [#allocation4], 1 }

</bundles_post_ra>
